<compile_context>
chip_gen: v6e
topology: v6e:2x2x1
jax: 0.10.0
libtpu: 0.0.40
codegen_flags: <defaults>
</compile_context>

<pallas_src>
import jax
import jax.numpy as jnp
from jax.experimental import pallas as pl
from jax.experimental.pallas import tpu as pltpu


def self_attn_kernel(x_ref, wvq_ref, wk_ref, bvq_ref, bk_ref, gamma_ref, out_ref):
    c = x_ref.shape[1]                             # channels (static)
    x = x_ref[0]                                   # (C, N) bf16

    # Fused V/Q projection: (C+C8, C) @ (C, N) -> (C+C8, N), f32 accumulation.
    # V is first so both row-splits are sublane-aligned (offsets 0 and C).
    vq = jnp.dot(wvq_ref[...], x, preferred_element_type=jnp.float32) + bvq_ref[...]
    v = vq[:c, :].astype(jnp.bfloat16)             # (C,  N)
    q = vq[c:, :].astype(jnp.bfloat16)             # (C8, N)

    # K projection; transpose the small (C8, N) result so the energy matmul is
    # a standard (N, C8) @ (C8, N) MXU op (no transposed contraction needed).
    k = jnp.dot(wk_ref[...], x, preferred_element_type=jnp.float32) + bk_ref[...]
    k_t = k.T.astype(jnp.bfloat16)                 # (N, C8)

    # energy^T[j, i] = sum_o k[o, j] * q[o, i]
    energy_t = jnp.dot(k_t, q, preferred_element_type=jnp.float32)      # (N, N) f32

    # Softmax over keys j (axis 0), f32; normalization deferred to the output.
    m = jnp.max(energy_t, axis=0, keepdims=True)                        # (1, N)
    p = jnp.exp(energy_t - m)                                           # (N, N) f32
    denom = jnp.sum(p, axis=0, keepdims=True)                           # (1, N)

    # out_un[c, i] = sum_j v[c, j] * p[j, i]   (standard (C,N) @ (N,N) matmul)
    out_un = jnp.dot(v, p.astype(jnp.bfloat16), preferred_element_type=jnp.float32)

    r = pl.reciprocal(denom, approx=True)                               # (1, N)
    gamma = gamma_ref[0]
    out_ref[0] = gamma * (out_un * r) + x.astype(jnp.float32)


def self_attn(x_nchw, wq, bq, wk, bk, wv, bv, gamma):
    """x_nchw: (B, C, W, H) float32; conv weights in PyTorch layout (out, in, 1, 1)."""
    B, C, W, H = x_nchw.shape
    N = W * H
    C8 = wq.shape[0]

    # Native layout: (B, C, N) is a pure reshape (no transpose); bf16 for the MXU.
    x_cn = x_nchw.reshape(B, C, N).astype(jnp.bfloat16)

    # 1x1 conv weights (out, in, 1, 1) -> (out, in).  Fuse V and Q into a single
    # projection matrix; keep K separate (its output gets transposed in-kernel).
    wvq = jnp.concatenate([wv.reshape(C, C), wq.reshape(C8, C)],
                          axis=0).astype(jnp.bfloat16)                  # (C+C8, C)
    wk_m = wk.reshape(C8, C).astype(jnp.bfloat16)                       # (C8, C)
    bvq = jnp.concatenate([bv, bq], axis=0).reshape(C + C8, 1).astype(jnp.float32)
    bk2 = bk.reshape(C8, 1).astype(jnp.float32)
    gamma = gamma.reshape(1).astype(jnp.float32)

    # Advisory cost estimate (projections + energy + PV; exp transcendentals).
    flops = 2 * B * (N * C * (C + 2 * C8) + N * N * (C + C8))
    bytes_accessed = (B * C * N * 2            # x (bf16 in)
                      + B * C * N * 4          # out (f32)
                      + (C + 2 * C8) * C * 2   # weights (bf16)
                      + (C + 2 * C8) * 4 + 4)  # biases + gamma (f32)
    cost = pl.CostEstimate(flops=flops, transcendentals=B * N * N,
                           bytes_accessed=bytes_accessed)

    out_cn = pl.pallas_call(
        self_attn_kernel,
        out_shape=jax.ShapeDtypeStruct((B, C, N), jnp.float32),
        grid_spec=pltpu.PrefetchScalarGridSpec(
            num_scalar_prefetch=0,
            grid=(B,),
            in_specs=[
                pl.BlockSpec((1, C, N), lambda b: (b, 0, 0)),     # x     (per batch)
                pl.BlockSpec((C + C8, C), lambda b: (0, 0)),      # W_vq  (constant)
                pl.BlockSpec((C8, C), lambda b: (0, 0)),          # W_k   (constant)
                pl.BlockSpec((C + C8, 1), lambda b: (0, 0)),      # b_vq  (constant)
                pl.BlockSpec((C8, 1), lambda b: (0, 0)),          # b_k   (constant)
                pl.BlockSpec(memory_space=pltpu.SMEM),            # gamma (scalar)
            ],
            out_specs=pl.BlockSpec((1, C, N), lambda b: (b, 0, 0)),
        ),
        compiler_params=pltpu.CompilerParams(
            dimension_semantics=("parallel",)),
        cost_estimate=cost,
    )(x_cn, wvq, wk_m, bvq, bk2, gamma)

    # (B, C, N) -> (B, C, W, H): pure reshape, no transpose.
    return out_cn.reshape(B, C, W, H)


def ref_forward(x, wq, bq, wk, bk, wv, bv, gamma):
    """Pure-JAX f32 reference matching the PyTorch forward exactly."""
    B, C, W, H = x.shape
    N = W * H
    C8 = wq.shape[0]
    xf = x.reshape(B, C, N)
    q = jnp.einsum('oc,bcn->bon', wq.reshape(C8, C), xf) + bq[None, :, None]
    k = jnp.einsum('oc,bcn->bon', wk.reshape(C8, C), xf) + bk[None, :, None]
    v = jnp.einsum('oc,bcn->bon', wv.reshape(C, C), xf) + bv[None, :, None]
    energy = jnp.einsum('bcn,bcm->bnm', q, k)             # (B, N, N)
    attn = jax.nn.softmax(energy, axis=-1)
    out = jnp.einsum('bcn,bmn->bcm', v, attn)             # (B, C, N)
    out = out.reshape(B, C, W, H)
    return gamma[0] * out + x


if __name__ == "__main__":
    B, C, W, H = 2, 32, 8, 8
    C8 = C // 8

    key = jax.random.PRNGKey(0)
    ks = jax.random.split(key, 7)
    x = jax.random.normal(ks[0], (B, C, W, H), jnp.float32)
    wq = 0.1 * jax.random.normal(ks[1], (C8, C, 1, 1), jnp.float32)
    bq = 0.1 * jax.random.normal(ks[2], (C8,), jnp.float32)
    wk = 0.1 * jax.random.normal(ks[3], (C8, C, 1, 1), jnp.float32)
    bk = 0.1 * jax.random.normal(ks[4], (C8,), jnp.float32)
    wv = 0.1 * jax.random.normal(ks[5], (C, C, 1, 1), jnp.float32)
    bv = 0.1 * jax.random.normal(ks[6], (C,), jnp.float32)

    # Module-faithful init: gamma = 0 (bf16 matmul path -> looser tolerance).
    gamma0 = jnp.zeros((1,), jnp.float32)
    out0 = jax.block_until_ready(self_attn(x, wq, bq, wk, bk, wv, bv, gamma0))
    ref0 = ref_forward(x, wq, bq, wk, bk, wv, bv, gamma0)
    assert out0.shape == (B, C, W, H)
    assert jnp.allclose(out0, ref0, atol=2e-2, rtol=2e-2), "gamma=0 mismatch"

    # Extra correctness check of the attention path with nonzero gamma.
    gamma1 = jnp.full((1,), 0.5, jnp.float32)
    out1 = jax.block_until_ready(self_attn(x, wq, bq, wk, bk, wv, bv, gamma1))
    ref1 = ref_forward(x, wq, bq, wk, bk, wv, bv, gamma1)
    assert jnp.allclose(out1, ref1, atol=2e-2, rtol=2e-2), "gamma=0.5 mismatch"

    print("KERNEL_OK")
</pallas_src>

<mosaic_0001>
module attributes {stable_mosaic.version = 11 : i64} {
  func.func @self_attn_kernel(%arg0: i32, %arg1: memref<1x32x64xbf16, #tpu.memory_space<vmem>>, %arg2: memref<36x32xbf16, #tpu.memory_space<vmem>>, %arg3: memref<4x32xbf16, #tpu.memory_space<vmem>>, %arg4: memref<36x1xf32, #tpu.memory_space<vmem>>, %arg5: memref<4x1xf32, #tpu.memory_space<vmem>>, %arg6: memref<1xf32, #tpu.memory_space<smem>>, %arg7: memref<1x32x64xf32, #tpu.memory_space<vmem>>) attributes {dimension_semantics = [#tpu.dimension_semantics<parallel>], iteration_bounds = array<i64: 2>, scalar_prefetch = 0 : i64, scratch_operands = 0 : i64, tpu.core_type = #tpu.core_type<tc>, window_params = [{transform_indices = @transform_0, window_bounds = array<i64: 1, 32, 64>}, {pipeline_mode = #tpu.pipeline_mode<synchronous>, transform_indices = @transform_1, window_bounds = array<i64: 36, 32>}, {pipeline_mode = #tpu.pipeline_mode<synchronous>, transform_indices = @transform_2, window_bounds = array<i64: 4, 32>}, {pipeline_mode = #tpu.pipeline_mode<synchronous>, transform_indices = @transform_3, window_bounds = array<i64: 36, 1>}, {pipeline_mode = #tpu.pipeline_mode<synchronous>, transform_indices = @transform_4, window_bounds = array<i64: 4, 1>}, {transform_indices = @transform_5, window_bounds = array<i64: 1>}, {transform_indices = @transform_6, window_bounds = array<i64: 1, 32, 64>}]} {
    %c0 = arith.constant 0 : index
    %c0_0 = arith.constant 0 : index
    %c0_1 = arith.constant 0 : index
    %0 = vector.load %arg1[%c0, %c0_0, %c0_1] : memref<1x32x64xbf16, #tpu.memory_space<vmem>>, vector<1x32x64xbf16>
    %1 = vector.shape_cast %0 : vector<1x32x64xbf16> to vector<32x64xbf16>
    %c0_2 = arith.constant 0 : index
    %c0_3 = arith.constant 0 : index
    %2 = vector.load %arg2[%c0_2, %c0_3] : memref<36x32xbf16, #tpu.memory_space<vmem>>, vector<36x32xbf16>
    %cst = arith.constant dense<0.000000e+00> : vector<36x64xf32>
    %3 = tpu.matmul %2, %1, %cst {dimension_numbers = #tpu.dot_dimension_numbers<[1], [0], [0], [1], [0, 0, 1, 1], [], []>} : vector<36x32xbf16>, vector<32x64xbf16>, vector<36x64xf32> -> vector<36x64xf32>
    %c0_4 = arith.constant 0 : index
    %c0_5 = arith.constant 0 : index
    %4 = vector.load %arg4[%c0_4, %c0_5] : memref<36x1xf32, #tpu.memory_space<vmem>>, vector<36x1xf32>
    %5 = vector.broadcast %4 : vector<36x1xf32> to vector<36x64xf32>
    %6 = arith.addf %3, %5 : vector<36x64xf32>
    %7 = vector.extract_strided_slice %6 {offsets = [0, 0], sizes = [32, 64], strides = [1, 1]} : vector<36x64xf32> to vector<32x64xf32>
    %8 = arith.truncf %7 : vector<32x64xf32> to vector<32x64xbf16>
    %9 = vector.extract_strided_slice %6 {offsets = [32, 0], sizes = [4, 64], strides = [1, 1]} : vector<36x64xf32> to vector<4x64xf32>
    %10 = arith.truncf %9 : vector<4x64xf32> to vector<4x64xbf16>
    %c0_6 = arith.constant 0 : index
    %c0_7 = arith.constant 0 : index
    %11 = vector.load %arg3[%c0_6, %c0_7] : memref<4x32xbf16, #tpu.memory_space<vmem>>, vector<4x32xbf16>
    %cst_8 = arith.constant dense<0.000000e+00> : vector<4x64xf32>
    %12 = tpu.matmul %11, %1, %cst_8 {dimension_numbers = #tpu.dot_dimension_numbers<[1], [0], [0], [1], [0, 0, 1, 1], [], []>} : vector<4x32xbf16>, vector<32x64xbf16>, vector<4x64xf32> -> vector<4x64xf32>
    %c0_9 = arith.constant 0 : index
    %c0_10 = arith.constant 0 : index
    %13 = vector.load %arg5[%c0_9, %c0_10] : memref<4x1xf32, #tpu.memory_space<vmem>>, vector<4x1xf32>
    %14 = vector.broadcast %13 : vector<4x1xf32> to vector<4x64xf32>
    %15 = arith.addf %12, %14 : vector<4x64xf32>
    %16 = tpu.transpose %15, [1, 0] : vector<4x64xf32> -> vector<64x4xf32>
    %17 = arith.truncf %16 : vector<64x4xf32> to vector<64x4xbf16>
    %cst_11 = arith.constant dense<0.000000e+00> : vector<64x64xf32>
    %18 = tpu.matmul %17, %10, %cst_11 {dimension_numbers = #tpu.dot_dimension_numbers<[1], [0], [0], [1], [0, 0, 1, 1], [], []>} : vector<64x4xbf16>, vector<4x64xbf16>, vector<64x64xf32> -> vector<64x64xf32>
    %cst_12 = arith.constant dense<0xFF800000> : vector<64xf32>
    %19 = vector.multi_reduction <maximumf>, %18, %cst_12 [0] : vector<64x64xf32> to vector<64xf32>
    %20 = vector.shape_cast %19 : vector<64xf32> to vector<1x64xf32>
    %21 = vector.broadcast %20 : vector<1x64xf32> to vector<64x64xf32>
    %22 = arith.subf %18, %21 : vector<64x64xf32>
    %23 = math.exp %22 : vector<64x64xf32>
    %cst_13 = arith.constant dense<0.000000e+00> : vector<64xf32>
    %24 = vector.multi_reduction <add>, %23, %cst_13 [0] : vector<64x64xf32> to vector<64xf32>
    %25 = vector.shape_cast %24 : vector<64xf32> to vector<1x64xf32>
    %26 = arith.truncf %23 : vector<64x64xf32> to vector<64x64xbf16>
    %cst_14 = arith.constant dense<0.000000e+00> : vector<32x64xf32>
    %27 = tpu.matmul %8, %26, %cst_14 {dimension_numbers = #tpu.dot_dimension_numbers<[1], [0], [0], [1], [0, 0, 1, 1], [], []>} : vector<32x64xbf16>, vector<64x64xbf16>, vector<32x64xf32> -> vector<32x64xf32>
    %28 = tpu.reciprocal %25 {approx = true} : vector<1x64xf32> -> vector<1x64xf32>
    %c0_15 = arith.constant 0 : index
    %29 = memref.load %arg6[%c0_15] : memref<1xf32, #tpu.memory_space<smem>>
    %30 = vector.broadcast %28 : vector<1x64xf32> to vector<32x64xf32>
    %31 = arith.mulf %27, %30 : vector<32x64xf32>
    %32 = vector.broadcast %29 : f32 to vector<32x64xf32>
    %33 = arith.mulf %32, %31 : vector<32x64xf32>
    %34 = arith.extf %1 : vector<32x64xbf16> to vector<32x64xf32>
    %35 = arith.addf %33, %34 : vector<32x64xf32>
    %c0_16 = arith.constant 0 : index
    %c0_17 = arith.constant 0 : index
    %c0_18 = arith.constant 0 : index
    %36 = vector.load %arg7[%c0_16, %c0_17, %c0_18] : memref<1x32x64xf32, #tpu.memory_space<vmem>>, vector<1x32x64xf32>
    %37 = vector.shape_cast %36 : vector<1x32x64xf32> to vector<32x64xf32>
    %38 = vector.shape_cast %35 : vector<32x64xf32> to vector<1x32x64xf32>
    tpu.vector_store %arg7[%c0_16, %c0_17, %c0_18], %38 {strides = array<i32>} : memref<1x32x64xf32, #tpu.memory_space<vmem>>, vector<1x32x64xf32>,
    return
  }
  func.func @transform_0(%arg0: i32) -> (i32, i32, i32) {
    %c0_i32 = arith.constant 0 : i32
    %c0_i32_0 = arith.constant 0 : i32
    %c0_i32_1 = arith.constant 0 : i32
    return %arg0, %c0_i32, %c0_i32_0 : i32, i32, i32
  }
  func.func @transform_1(%arg0: i32) -> (i32, i32) {
    %c0_i32 = arith.constant 0 : i32
    %c0_i32_0 = arith.constant 0 : i32
    %c0_i32_1 = arith.constant 0 : i32
    return %c0_i32, %c0_i32_0 : i32, i32
  }
  func.func @transform_2(%arg0: i32) -> (i32, i32) {
    %c0_i32 = arith.constant 0 : i32
    %c0_i32_0 = arith.constant 0 : i32
    %c0_i32_1 = arith.constant 0 : i32
    return %c0_i32, %c0_i32_0 : i32, i32
  }
  func.func @transform_3(%arg0: i32) -> (i32, i32) {
    %c0_i32 = arith.constant 0 : i32
    %c0_i32_0 = arith.constant 0 : i32
    %c0_i32_1 = arith.constant 0 : i32
    return %c0_i32, %c0_i32_0 : i32, i32
  }
  func.func @transform_4(%arg0: i32) -> (i32, i32) {
    %c0_i32 = arith.constant 0 : i32
    %c0_i32_0 = arith.constant 0 : i32
    %c0_i32_1 = arith.constant 0 : i32
    return %c0_i32, %c0_i32_0 : i32, i32
  }
  func.func @transform_5(%arg0: i32) -> i32 {
    %c0_i32 = arith.constant 0 : i32
    %c0_i32_0 = arith.constant 0 : i32
    return %c0_i32 : i32
  }
  func.func @transform_6(%arg0: i32) -> (i32, i32, i32) {
    %c0_i32 = arith.constant 0 : i32
    %c0_i32_0 = arith.constant 0 : i32
    %c0_i32_1 = arith.constant 0 : i32
    return %arg0, %c0_i32, %c0_i32_0 : i32, i32, i32
  }
}

</mosaic_0001>

<bundles_post_ra>
// kernel: tpu_custom_call.1
= control target key start
LH: loop header
LB: loop body
LE: loop exit
PB: predicated region body
PF: predicated region fallthrough
CT: control target
= control target key end

     0   :  { %s1235_s0 = inlined_call_operand.vmem [shape: bf16[2,32,64], index: 0, kind: input, shape index: {}]   ;;  %s1236_s1 = inlined_call_operand.vmem [shape: bf16[36,32], index: 1, kind: input, shape index: {}]   ;;  %s1237_s2 = inlined_call_operand.vmem [shape: bf16[4,32], index: 2, kind: input, shape index: {}]   ;;  %s1238_s3 = inlined_call_operand.vmem [shape: f32[36,1], index: 3, kind: input, shape index: {}]   ;;  %s1239_s4 = inlined_call_operand.vmem [shape: f32[4,1], index: 4, kind: input, shape index: {}]   ;;  %s1240_s5 = inlined_call_operand.<no memory space> [shape: f32[1], index: 5, kind: input, shape index: {}]   ;;  %s1241_s6 = inlined_call_operand.hbm [shape: f32[2,32,64], index: 6, kind: output, shape index: {}]  }
   0x1   :  { %11 = sst [smem:[#allocation2]] %s1240_s5 }
   0x2   :  { %12 = vsyncpa [#allocation4], 0 }
   0x3   :  { %14 = vsyncpa [#allocation4 + $0x1], 0  ;;  %s1050_s23 = smov 0   ;;  %s1052_s24 = smov 0  }
   0x4   :  { %s1054_s25 = smov 0   ;;  %s1056_s26 = smov 0  }
   0x5 LB: > { %s1071_s5 = sadd.s32 4294967295, %s1004_s26   ;;  %s778_s27 = sadd.s32 4294967294, %s1004_s26   ;;  %s1004_s26 = sphi %s1056_s26, %s1247_s26   ;;  %s1000_s25 = sphi %s1054_s25, %s1246_s25   ;;  %s996_s24 = sphi %s1052_s24, %s1245_s24   ;;  %s992_s23 = sphi %s1050_s23, %s1244_s23  }
   0x6   : > { %s1075_s28 = sadd.s32 1, %s1004_s26   ;;  %s158_s29 = sadd.s32 1, %s1000_s25 }
   0x7   : > { %s155_s30 = ssub.s32 %s1004_s26, %s1075_s28  ;;  %p168_p0 = scmp.ne.s32.totalorder %s1000_s25, %s996_s24 }
   0x8   : > { %p156_p1 = scmp.eq.s32.totalorder %s155_s30, 0  ;;  %p169_p2 = scmp.eq.s32.totalorder %s1071_s5, 1 }
   0x9   : > { %p174_p3 = scmp.ne.s32.totalorder %s996_s24, %s992_s23  ;;  %p175_p4 = scmp.eq.s32.totalorder %s778_s27, 1 }
   0xa   : > { %s1086_s7 = scalar_select %p156_p1, %s1000_s25, %s158_s29  }
   0xb   : > { %p1088_p5 = por %p169_p2, %p168_p0  ;;  %p1092_p6 = por %p175_p4, %p174_p3 }
   0xc   : > { %p781_p7 = scmp.ge.s32.totalorder %s1004_s26, 1  ;;  %p216_p8 = scmp.lt.s32.totalorder %s1004_s26, 3 }
   0xe   : > { %p217_p9 = pnand %p781_p7, %p216_p8 }
   0xf   : > { %p246_p10 = scmp.lt.s32.totalorder (!%p217_p9), %s1071_s5, 1  ;;  %s680_s19 = sld [smem:[#allocation2]] (!%p217_p9) }
  0x10   : > { %220 = sbr.rel (%p217_p9) target bundleno = 864 (0x360), region = 44  ;;  %s243_s20 = sand.u32 (!%p217_p9), 1, %s996_s24  }
  0x11   : > { %s782_s21 = sshll.u32 (!%p217_p9), %s243_s20, 5  ;;  %s806_s27 = sshll.u32 (!%p217_p9), %s1071_s5, 9 }
  0x12   : > { %s245_s22 = scalar_lea.vmem (!%p217_p9), [#allocation3], %s782_s21  ;;  %s1009_s13 = smov (!%p217_p9), [#allocation3]  }
  0x13   : > { %s716_s29 = sshll.u32 (!%p217_p9), %s245_s22, 4  ;;  %s948_s14 = sshll.u32 (!%p217_p9), %s1009_s13, 4  ;;  %s1189_s29 = int_to_ptr.vmem [resolvable:$true] %s716_s29  ;;  %s949_s14 = int_to_ptr.vmem [resolvable:$false] %s948_s14 }
  0x14   : > { %s944_s12 = scalar_lea.vmem (!%p217_p9), %s1189_s29, 512  ;;  %s950_s15 = scalar_lea.vmem (!%p217_p9), %s949_s14, 1024 }
  0x15   : > { %v1006_v0 = vmov 0.0   ;;  %s247_s10 = scalar_select %p246_p10, %s1071_s5, 1  ;;  %vm1007_vm0 = vmmov 0   ;;  %v1008_v1 = vmov 0   ;;  %v386_v2 = vld [vmem:[%s1239_s4] sm:$0xf] }
  0x16   : > { %826 = vmatprep.subr.bf16.mxu0 %v1006_v0  ;;  %842 = vmatprep.subr.bf16.mxu1 %v1006_v0  ;;  %v265_v5 = vld [vmem:[%s1238_s3 + $0x20] sm:$0xf]  ;;  %v262_v7 = vld [vmem:[%s1238_s3 + $0x8] sm:$0xff]  ;;  %vm316_vm1 = vcmask 261120   ;;  %v263_v9 = vld [vmem:[%s1238_s3 + $0x10] sm:$0xff]  ;;  %vm484_vm2 = vcmask 1041408   ;;  %p945_p11 = scmp.ne.s32.totalorder %s1189_s29, %s944_s12  ;;  %p951_p0 = scmp.lt.s32.totalorder %s1189_s29, %s949_s14 }
  0x17   : > { %830 = vmatprep.mubr.msk.bf16.mxu0 %vm1007_vm0, %v1006_v0  ;;  %846 = vmatprep.mubr.msk.bf16.mxu1 %vm1007_vm0, %v1006_v0  ;;  %s805_s11 = sshll.u32 %s247_s10, 4  ;;  %v921_v6 = vld [vmem:[%s1236_s1] sm:$0xff]   ;;  %v922_v10 = vld [vmem:[%s1236_s1 + $0x8] sm:$0xff]   ;;  %v264_v11 = vld [vmem:[%s1238_s3 + $0x18] sm:$0xff]  ;;  %vm471_vm3 = vcmask 31744   ;;  %vm553_vm4 = vcmask 523264   ;;  %p952_p1 = scmp.lt.s32.totalorder %s950_s15, %s944_s12 }
  0x18   : > { %917 = vset.pattern.permute.xlu0 %v1008_v1  ;;  %s250_s16 = scalar_lea.vmem %s1235_s0, %s805_s11  ;;  %v385_v8 = vld [vmem:[%s1237_s2] sm:$0x3]  ;;  %v923_v12 = vld [vmem:[%s1236_s1 + $0x10] ss:$0 sps:$4 sm:$0x33]   ;;  %s1187_s11 = scalar_lea.hbm %s1241_s6, %s806_s27 }
  0x19   : > { %389 = vperm.xlu0 %917, %v386_v2   ;;  %v1109_v3 = vld [vmem:[%s250_s16 + $0x8] sm:$0xff]   ;;  %v1111_v4 = vld [vmem:[%s250_s16] sm:$0xff]   ;;  %s1195_s5 = scalar_lea.sflag [#allocation4], %s243_s20  ;;  %p946_p12 = pnand %p945_p11, %p1088_p5 }
  0x1a   : > { %827 = vmatpush3.bf16.msra.mxu0 %v1109_v3  ;;  %843 = vmatpush3.bf16.msra.mxu1 %v1109_v3  ;;  %v261_v41 = vld [vmem:[%s1238_s3] sm:$0xff]  ;;  %p953_p2 = por %p952_p1, %p951_p0 }
  0x1b   : > { %828 = vmatprep.subr.bf16.mxu0 %v1006_v0  ;;  %844 = vmatprep.subr.bf16.mxu1 %v1006_v0  ;;  %p947_p13 = pneg %p946_p12 }
  0x1d   : > { %288 = vperm.xlu0 %917, %v265_v5   ;;  %p954_p3 = pnand %p953_p2, %p947_p13 }
  0x1e   : > { %829 = vmatpush3.bf16.msra.mxu0 %v1111_v4  ;;  %845 = vmatpush3.bf16.msra.mxu1 %v1111_v4 }
  0x21   : > { %273 = vperm.xlu0 %917, %v262_v7   ;;  %831 = vmatmul.mubr.msk.bf16.vlgmr.msra.gmra.mxu0 %vm316_vm1, %v921_v6 }
  0x22   : > { %847 = vmatmul.mubr.msk.bf16.vlgmr.msra.gmra.mxu1 %vm316_vm1, %v385_v8  ;;  %834 = vmatprep.mubr.msk.bf16.mxu0 %vm1007_vm0, %v1006_v0 }
  0x25   : > { %278 = vperm.xlu0 %917, %v263_v9  }
  0x29   : > { %283 = vperm.xlu0 %917, %v264_v11   ;;  %835 = vmatmul.mubr.msk.bf16.gmra.mxu0 %vm316_vm1, %v922_v10 }
  0x2a   : > { %838 = vmatprep.mubr.msk.bf16.mxu0 %vm1007_vm0, %v1006_v0 }
  0x31   : > { %839 = vmatmul.mubr.msk.bf16.gmra.mxu0 %vm316_vm1, %v923_v12 }
  0x94   : > { %v390_v13 = vpop.permute.xlu0 %389 }
  0x98   : > { %v289_v14 = vpop.permute.xlu0 %288 }
  0x9c   : > { %v274_v15 = vpop.permute.xlu0 %273 }
  0xa0   : > { %v279_v23 = vpop.permute.xlu0 %278 }
  0xa4   : > { %v284_v28 = vpop.permute.xlu0 %283 }
  0xe1   : > { %v360_v16 = vpop.f32.mrf.mxu0 }
  0xe2   : > { %v429_v17 = vpop.f32.mrf.mxu1 }
  0xe3   : > { %v430_v18 = vadd.f32 %v429_v17, %v390_v13  ;;  %v832_v19 = vpop.f32.mrf.mxu0 }
  0xe4   : > { %v848_v20 = vpop.f32.mrf.mxu1 }
  0xe5   : > { %435 = vxpose.xlu1.b32.start.end [1/1] (short) (narrow) %v430_v18, 64  ;;  %v363_v21 = vpop.f32.mrf.mxu0 }
  0xe6   : > { %v432_v22 = vpop.f32.mrf.mxu1  ;;  %v364_v55 = vadd.f32 %v363_v21, %v274_v15 }
  0xe7   : > { %v833_v24 = vpop.f32.mrf.mxu0 }
  0xe8   : > { %v849_v25 = vpop.f32.mrf.mxu1 }
  0xe9   : > { %v368_v26 = vpop.f32.mrf.mxu0 }
  0xea   : > { %v1143_v30 = vadd.f32 %v368_v26, %v279_v23 }
  0xeb   : > { %v836_v27 = vpop.f32.mrf.mxu0 }
  0xed   : > { %v371_v29 = vpop.f32.mrf.mxu0 }
  0xee   : > { %v1145_v31 = vadd.f32 %v371_v29, %v284_v28 }
  0xef   : > { %v837_v32 = vpop.f32.mrf.mxu0 }
  0xf0   : > { %v383_v33 = vpack.c.bf16 %v1145_v31, %v1143_v30  ;;  %v690_v31 = vunpack.c.l.bf16 %v1111_v4 }
  0xf1   : > { %v376_v34 = vpop.f32.mrf.mxu0 }
  0xf2   : > { %v377_v35 = vadd.f32 %v376_v34, %v289_v14 }
  0xf3   : > { %v840_v36 = vpop.f32.mrf.mxu0 }
  0xf4   : > { %v384_v37 = vpack.c.bf16 %v377_v35, %v377_v35 }
  0xf5   : > { %v379_v38 = vpop.f32.mrf.mxu0 }
  0xf6   : > { %v486_v39 = vsel %vm484_vm2, %v384_v37, 0  ;;  %872 = vmatprep.subr.msk.bf16.mxu1 %vm484_vm2, %v384_v37 }
  0xf7   : > { %851 = vmatpush3.bf16.msra.mxu1 %v486_v39  ;;  %v841_v40 = vpop.f32.mrf.mxu0 }
 0x103   : > { %918 = vset.pattern.permute.xlu1 %v1008_v1 }
 0x11f   : > { %268 = vperm.xlu1 %918, %v261_v41  }
 0x161   : > { %v451_v42 = vpop.trf.xlu1 }
 0x165   : > { %v452_v43 = vpop.trf.xlu1 }
 0x166   : > { %v467_v44 = vpack.c.bf16 %v452_v43, %v451_v42 }
 0x168   : > { %852 = vmatprep.mubr.msk.bf16.mxu1 %vm471_vm3, %v467_v44 }
 0x169   : > { %v453_v45 = vpop.trf.xlu1 }
 0x16d   : > { %v454_v46 = vpop.trf.xlu1 }
 0x16e   : > { %v468_v47 = vpack.c.bf16 %v454_v46, %v453_v45 }
 0x170   : > { %853 = vmatmul.mubr.msk.bf16.vlgmr.msra.gmra.mxu1 %vm471_vm3, %v468_v47 }
 0x171   : > { %v455_v48 = vpop.trf.xlu1 }
 0x175   : > { %v456_v49 = vpop.trf.xlu1 }
 0x176   : > { %v469_v50 = vpack.c.bf16 %v456_v49, %v455_v48 }
 0x178   : > { %856 = vmatprep.mubr.msk.bf16.mxu1 %vm471_vm3, %v469_v50 }
 0x179   : > { %v457_v51 = vpop.trf.xlu1 }
 0x17d   : > { %v458_v52 = vpop.trf.xlu1 }
 0x17e   : > { %v470_v53 = vpack.c.bf16 %v458_v52, %v457_v51 }
 0x180   : > { %857 = vmatmul.mubr.msk.bf16.gmra.mxu1 %vm471_vm3, %v470_v53 }
 0x19a   : > { %v269_v54 = vpop.permute.xlu1 %268 }
 0x19b   : > { %v361_v56 = vadd.f32 %v360_v16, %v269_v54 }
 0x19d   : > { %v382_v57 = vpack.c.bf16 %v364_v55, %v361_v56 }
 0x19f   : > { %868 = vmatprep.mubr.msk.bf16.mxu0 %vm553_vm4, %v382_v57 }
 0x230   : > { %v854_v58 = vpop.f32.mrf.mxu1 }
 0x231   : > { %v556_v9 = vsel %vm553_vm4, %v854_v58, -inf }
 0x232   : > { %v522_v59 = vpop.f32.mrf.mxu1 }
 0x233   : > { %v554_v10 = vsel %vm553_vm4, %v522_v59, -inf }
 0x234   : > { %v855_v60 = vpop.f32.mrf.mxu1 }
 0x235   : > { %v557_v1 = vsel %vm553_vm4, %v855_v60, -inf }
 0x236   : > { %v525_v61 = vpop.f32.mrf.mxu1 }
 0x237   : > { %v555_v11 = vsel %vm553_vm4, %v525_v61, -inf }
 0x240   : > { %v858_v62 = vpop.f32.mrf.mxu1 }
 0x241   : > { %v562_v2 = vsel %vm553_vm4, %v858_v62, -inf }
 0x242   : > { %v538_v63 = vpop.f32.mrf.mxu1  ;;  %v563_v13 = vmax.f32 %v556_v9, %v562_v2 }
 0x243   : > { %v558_v5 = vsel %vm553_vm4, %v538_v63, -inf }
 0x244   : > { %v859_v0 = vpop.f32.mrf.mxu1  ;;  %v559_v14 = vmax.f32 %v554_v10, %v558_v5 }
 0x245   : > { %v564_v6 = vsel %vm553_vm4, %v859_v0, -inf }
 0x246   : > { %v565_v7 = vmax.f32 %v557_v1, %v564_v6  ;;  %v541_v8 = vpop.f32.mrf.mxu1 }
 0x247   : > { %v560_v12 = vsel %vm553_vm4, %v541_v8, -inf }
 0x248   : > { %v561_v15 = vmax.f32 %v555_v11, %v560_v12  ;;  %v567_v16 = vmax.f32 %v563_v13, %v565_v7 }
 0x24a   : > { %v566_v17 = vmax.f32 %v559_v14, %v561_v15 }
 0x24c   : > { %v568_v18 = vmax.f32 %v566_v17, %v567_v16  ;;  %v685_v17 = vstv %s680_s19 }
 0x24e   : > { %v569_v19 = vrot.slane %v568_v18, 4 }
 0x250   : > { %v570_v20 = vmax.f32 %v568_v18, %v569_v19  ;;  %v692_v18 = vunpack.c.l.bf16 %v1109_v3 }
 0x252   : > { %v571_v21 = vrot.slane %v570_v20, 2 }
 0x254   : > { %v572_v22 = vmax.f32 %v570_v20, %v571_v21 }
 0x256   : > { %v573_v23 = vrot.slane %v572_v22, 1 }
 0x258   : > { %v574_v24 = vmax.f32 %v572_v22, %v573_v23  ;;  %v693_v22 = vunpack.c.h.bf16 %v1109_v3 }
 0x25a   : > { %v575_v25 = vsub.f32 %v522_v59, %v574_v24  ;;  %v576_v26 = vsub.f32 %v525_v61, %v574_v24  ;;  %v577_v27 = vsub.f32 %v854_v58, %v574_v24  ;;  %v578_v28 = vsub.f32 %v855_v60, %v574_v24 }
 0x25b   : > { %v579_v29 = vsub.f32 %v538_v63, %v574_v24  ;;  %v580_v32 = vsub.f32 %v541_v8, %v574_v24  ;;  %v581_v37 = vsub.f32 %v858_v62, %v574_v24  ;;  %v582_v39 = vsub.f32 %v859_v0, %v574_v24 }
 0x25c   : > { %v583_v34 = vmul.f32 1.442695, %v575_v25  ;;  %v585_v35 = vmul.f32 1.442695, %v576_v26  ;;  %v587_v36 = vmul.f32 1.442695, %v577_v27  ;;  %v691_v27 = vunpack.c.h.bf16 %v1111_v4 }
 0x25d   : > { %v589_v38 = vmul.f32 1.442695, %v578_v28  ;;  %v591_v40 = vmul.f32 1.442695, %v579_v29  ;;  %v593_v41 = vmul.f32 1.442695, %v580_v32 }
 0x25e   : > { %926 = vpow2.f32 %v583_v34  ;;  %v595_v42 = vmul.f32 1.442695, %v581_v37  ;;  %v597_v43 = vmul.f32 1.442695, %v582_v39 }
 0x25f   : > { %928 = vpow2.f32 %v585_v35 }
 0x260   : > { %930 = vpow2.f32 %v587_v36 }
 0x261   : > { %932 = vpow2.f32 %v589_v38 }
 0x262   : > { %934 = vpow2.f32 %v591_v40 }
 0x263   : > { %936 = vpow2.f32 %v593_v41 }
 0x264   : > { %938 = vpow2.f32 %v595_v42 }
 0x265   : > { %940 = vpow2.f32 %v597_v43 }
 0x26b   : > { %v927_v44 = vpop.eup %926 }
 0x26c   : > { %v929_v45 = vpop.eup %928  ;;  %v599_v46 = vsel %vm553_vm4, %v927_v44, 0.0 }
 0x26d   : > { %v931_v47 = vpop.eup %930  ;;  %v600_v48 = vsel %vm553_vm4, %v929_v45, 0.0  ;;  %v620_v8 = vpack.c.bf16 %v929_v45, %v927_v44 }
 0x26e   : > { %v933_v49 = vpop.eup %932  ;;  %v601_v50 = vadd.f32 %v600_v48, %v599_v46  ;;  %v602_v52 = vsel %vm553_vm4, %v931_v47, 0.0 }
 0x26f   : > { %v935_v51 = vpop.eup %934  ;;  %v604_v56 = vsel %vm553_vm4, %v933_v49, 0.0  ;;  %v621_v6 = vpack.c.bf16 %v933_v49, %v931_v47 }
 0x270   : > { %v937_v53 = vpop.eup %936  ;;  %v603_v54 = vadd.f32 %v602_v52, %v601_v50  ;;  %v606_v59 = vsel %vm553_vm4, %v935_v51, 0.0 }
 0x271   : > { %v939_v55 = vpop.eup %938  ;;  %v608_v62 = vsel %vm553_vm4, %v937_v53, 0.0  ;;  %v622_v63 = vpack.c.bf16 %v937_v53, %v935_v51 }
 0x272   : > { %v941_v57 = vpop.eup %940  ;;  %v605_v58 = vadd.f32 %v604_v56, %v603_v54  ;;  %v610_v1 = vsel %vm553_vm4, %v939_v55, 0.0 }
 0x273   : > { %v623_v60 = vpack.c.bf16 %v941_v57, %v939_v55  ;;  %v612_v5 = vsel %vm553_vm4, %v941_v57, 0.0 }
 0x274   : > { %v607_v61 = vadd.f32 %v606_v59, %v605_v58 }
 0x275   : > { %860 = vmatprep.subr.bf16.mxu0 %v623_v60 }
 0x276   : > { %v609_v0 = vadd.f32 %v608_v62, %v607_v61  ;;  %861 = vmatpush3.bf16.msra.mxu0 %v623_v60 }
 0x277   : > { %862 = vmatprep.subr.bf16.mxu0 %v622_v63 }
 0x278   : > { %v611_v2 = vadd.f32 %v610_v1, %v609_v0 }
 0x27a   : > { %v613_v7 = vadd.f32 %v612_v5, %v611_v2  ;;  %863 = vmatpush3.bf16.msra.mxu0 %v622_v63 }
 0x27b   : > { %864 = vmatprep.subr.bf16.mxu0 %v621_v6 }
 0x27c   : > { %v614_v9 = vrot.slane %v613_v7, 4 }
 0x27e   : > { %865 = vmatpush3.bf16.msra.mxu0 %v621_v6  ;;  %v615_v10 = vadd.f32 %v614_v9, %v613_v7 }
 0x27f   : > { %866 = vmatprep.subr.bf16.mxu0 %v620_v8 }
 0x280   : > { %v616_v11 = vrot.slane %v615_v10, 2 }
 0x282   : > { %867 = vmatpush3.bf16.msra.mxu0 %v620_v8  ;;  %v617_v12 = vadd.f32 %v616_v11, %v615_v10 }
 0x284   : > { %v618_v13 = vrot.slane %v617_v12, 1 }
 0x285   : > { %869 = vmatmul.mubr.msk.bf16.vlgmr.msra.gmra.mxu0 %vm553_vm4, %v383_v33 }
 0x286   : > { %v619_v14 = vadd.f32 %v618_v13, %v617_v12 }
 0x288   : > { %942 = vrcp.f32 %v619_v14 }
 0x295   : > { %v943_v15 = vpop.eup %942 }
 0x345   : > { %v870_v16 = vpop.f32.mrf.mxu0 }
 0x346   : > { %v683_v19 = vmul.f32 %v943_v15, %v870_v16 }
 0x347   : > { %v664_v30 = vpop.f32.mrf.mxu0 }
 0x348   : > { %v688_v33 = vmul.f32 %v685_v17, %v683_v19  ;;  %v681_v20 = vmul.f32 %v943_v15, %v664_v30 }
 0x349   : > { %v871_v21 = vpop.f32.mrf.mxu0 }
 0x34a   : > { %v696_v23 = vadd.f32 %v692_v18, %v688_v33  ;;  %v686_v24 = vmul.f32 %v685_v17, %v681_v20  ;;  %v684_v25 = vmul.f32 %v943_v15, %v871_v21 }
 0x34b   : > { %v667_v26 = vpop.f32.mrf.mxu0 }
 0x34c   : > { %700 = vst.msk [vmem:[%s245_s22 + $0x10] sm:$0xff] %vm553_vm4, %v696_v23  ;;  %v694_v28 = vadd.f32 %v690_v31, %v686_v24  ;;  %v689_v29 = vmul.f32 %v685_v17, %v684_v25  ;;  %v682_v32 = vmul.f32 %v943_v15, %v667_v26 }
 0x34e   : > { %698 = vst.msk [vmem:[%s245_s22] sm:$0xff] %vm553_vm4, %v694_v28  ;;  %v697_v34 = vadd.f32 %v693_v22, %v689_v29  ;;  %v687_v3 = vmul.f32 %v685_v17, %v682_v32 }
 0x350   : > { %701 = vst.msk [vmem:[%s245_s22 + $0x18] sm:$0xff] %vm553_vm4, %v697_v34  ;;  %v695_v4 = vadd.f32 %v691_v27, %v687_v3 }
 0x352   : > { %699 = vst.msk [vmem:[%s245_s22 + $0x8] sm:$0xff] %vm553_vm4, %v695_v4 }
 0x353   : > { %957 = shalt.err (!%p954_p3)
}
 0x354   : > { %s958_s16 = scalar_lea.hbm %s1187_s11, 512  ;;  %s962_s19 = scalar_lea.hbm %s1241_s6, 1024 }
 0x355   : > { %p959_p4 = scmp.ne.s32.totalorder %s1187_s11, %s958_s16  ;;  %p963_p9 = scmp.lt.s32.totalorder %s1187_s11, %s1241_s6 }
 0x356   : > { %p964_p10 = scmp.lt.s32.totalorder %s962_s19, %s958_s16 }
 0x357   : > { %p960_p7 = pnand %p959_p4, %p1088_p5 }
 0x358   : > { %p965_p11 = por %p964_p10, %p963_p9 }
 0x359   : > { %p961_p8 = pneg %p960_p7 }
 0x35b   : > { %p966_p12 = pnand %p965_p11, %p961_p8 }
 0x35d   : > { %969 = shalt.err (!%p966_p12)
}
 0x35e   : > { %s1010_s22 = smov 128   ;;  %s1011_s27 = smov 8  }
 0x35f   : > { %873 = dma.vmem_to_hbm [thread:$0]  (%p1088_p5), %s1189_s29, 512, %s1187_s11, %s1195_s5, %s1010_s22, %s1010_s22, %s1011_s27  }
 0x360 PF: > { %p879_p13 = scmp.ge.s32.totalorder %s1004_s26, 2  ;;  %s731_s30 = sand.u32 1, %s992_s23  }
 0x361   : > { %s732_s10 = scalar_lea.sflag [#allocation4], %s731_s30 }
 0x362   : > { %p876_p0 = pnand %p879_p13, %p1092_p6 }
 0x364   : > { %p877_p1 = pneg %p876_p0 }
 0x366   : > { %987 = dma.done.wait (%p877_p1), %s732_s10, 512  }
 0x367   : > { %989 = vsyncadd (%p877_p1), %s732_s10, 4294966784  ;;  %p17_p2 = scmp.ge.s32.totalorder %s1075_s28, 4   ;;  %s1244_s23 = smov %s996_s24 }
 0x368   : > { %s1245_s24 = smov %s1000_s25  ;;  %s1246_s25 = smov %s1086_s7 }
 0x369   : > { %s1247_s26 = smov %s1075_s28  ;;  %19 = sbr.rel (!%p17_p2) target bundleno = 5 (0x5), region = 79 }
 0x36e   :  { %737 = vsyncpa [#allocation4], 1 }
 0x36f   :  { %739 = vsyncpa [#allocation4 + $0x1], 1 }

</bundles_post_ra>
